<compile_context>
chip_gen: v6e
topology: v6e:2x2x1
jax: 0.10.0
libtpu: 0.0.40
codegen_flags: <defaults>
</compile_context>

<pallas_src>
import jax
import jax.numpy as jnp
from jax import lax
from jax.experimental import pallas as pl
from jax.experimental.pallas import tpu as pltpu


def _make_skconv_kernel(M, Cout, B, HW, neg_slope=0.2):
    BHW = B * HW

    def kernel(x_ref, w_ref, scale_ref, bias_ref, pool_ref, expand_ref,
               fcwT_ref, fcb_ref, fcswT_ref, fcsb_ref, o_ref, feas_ref):
        # ---- all M branch convolutions in ONE MXU push ----------------------
        #   (M*Cout, KKCin) @ (KKCin, B*HW) -> (M*Cout, B*HW), lane-dense.
        conv = jnp.dot(w_ref[...], x_ref[...],
                       preferred_element_type=jnp.float32)
        # fused eval-mode BatchNorm (+ folded conv bias), then LeakyReLU(0.2)
        fea = conv * scale_ref[...] + bias_ref[...]
        fea = jnp.where(fea >= 0, fea, neg_slope * fea)
        feas_ref[...] = fea                                   # park branch maps in VMEM

        # ---- global average pool via block-pooling matmul (no relayout) -----
        gap = jnp.dot(fea, pool_ref[...],
                      preferred_element_type=jnp.float32)     # (M*Cout, B)
        fea_s = gap[0:Cout]
        for i in range(1, M):
            fea_s = fea_s + gap[i * Cout:(i + 1) * Cout]      # (Cout, B)

        # ---- squeeze / excite ------------------------------------------------
        z = jnp.dot(fcwT_ref[...], fea_s,
                    preferred_element_type=jnp.float32) + fcb_ref[...]        # (d, B)
        logits = jnp.dot(fcswT_ref[...], z,
                         preferred_element_type=jnp.float32) + fcsb_ref[...]  # (M*Cout, B)

        # softmax over the branch dim (static, Cout-aligned sublane slices)
        lg = [logits[i * Cout:(i + 1) * Cout] for i in range(M)]
        mx = lg[0]
        for i in range(1, M):
            mx = jnp.maximum(mx, lg[i])
        es = [jnp.exp(v - mx) for v in lg]
        denom = es[0]
        for i in range(1, M):
            denom = denom + es[i]
        inv_denom = 1.0 / denom      # exact divide keeps the 1e-4 ref check tight

        # ---- attention-weighted branch sum -----------------------------------
        # Per-sample broadcast of the (Cout, B) attention to (Cout, B*HW) goes
        # through the otherwise-idle MXU (block-expansion matmul) instead of a
        # sublane reshape / relayout.
        expand = expand_ref[...]                              # (B, B*HW)
        fea_v = jnp.zeros((Cout, BHW), jnp.float32)
        for i in range(M):
            att_i = es[i] * inv_denom                         # (Cout, B)
            att_x = jnp.dot(att_i, expand,
                            preferred_element_type=jnp.float32)   # (Cout, B*HW)
            fea_v = fea_v + feas_ref[i * Cout:(i + 1) * Cout, :] * att_x

        # lane-dense stores: one (Cout, HW) slab per sample (HW = 256 lanes)
        for b in range(B):
            o_ref[b] = fea_v[:, b * HW:(b + 1) * HW].astype(o_ref.dtype)

    return kernel


def _im2col(x_nchw, k_max, p_max, dtype):
    """Hoisted im2col: (k_max*k_max*Cin, N*H*W); rows (kh, kw, cin), cols (n, h, w)."""
    N, Cin, H, W = x_nchw.shape
    HW = H * W
    x_pad = jnp.pad(x_nchw.astype(jnp.float32),
                    ((0, 0), (0, 0), (p_max, p_max), (p_max, p_max)))
    taps = []
    for kh in range(k_max):
        for kw in range(k_max):
            t = x_pad[:, :, kh:kh + H, kw:kw + W]             # (N, Cin, H, W)
            taps.append(jnp.transpose(t, (1, 0, 2, 3)).reshape(Cin, N * HW))
    return jnp.concatenate(taps, axis=0).astype(dtype)        # (KK*Cin, N*HW)


def _prepare_kernel_params(params, M, G, B_tile, HW):
    """Host-side fold of parameters into the fused, kernel-friendly layouts."""
    CinG = params["conv_w"][0].shape[2]
    Cout = params["conv_w"][0].shape[3]
    Cin = CinG * G
    CoutG = Cout // G
    k_max = 1 + 2 * (M - 1)
    p_max = M - 1
    KK = k_max * k_max

    # one stacked (M*Cout, KK*Cin) weight; branch i only occupies its tap window
    w_rows = []
    for i in range(M):
        w = params["conv_w"][i].astype(jnp.float32)           # (k, k, CinG, Cout)
        k = w.shape[0]
        off = p_max - i
        wd = jnp.zeros((k, k, Cin, Cout), jnp.float32)        # block-diagonal dense
        for g in range(G):
            wd = wd.at[:, :, g * CinG:(g + 1) * CinG,
                       g * CoutG:(g + 1) * CoutG].set(w[:, :, :, g * CoutG:(g + 1) * CoutG])
        Wi = jnp.zeros((Cout, k_max, k_max, Cin), jnp.float32)
        Wi = Wi.at[:, off:off + k, off:off + k, :].set(jnp.transpose(wd, (3, 0, 1, 2)))
        w_rows.append(Wi.reshape(Cout, KK * Cin))
    w_all = jnp.concatenate(w_rows, axis=0)                   # (M*Cout, KK*Cin)

    inv_hw = 1.0 / float(HW)
    eye = jnp.eye(B_tile, dtype=jnp.float32)
    pool = jnp.repeat(eye, HW, axis=0) * inv_hw               # (B*HW, B): GAP as matmul
    expand = jnp.repeat(eye, HW, axis=1)                      # (B, B*HW): broadcast as matmul

    return dict(
        w_all=w_all,
        bn_scale=params["bn_scale"].reshape(M * Cout, 1),
        bn_bias=params["bn_bias"].reshape(M * Cout, 1),
        pool=pool, expand=expand,
        fc_wT=params["fc_w"].T,                               # (d, Cout)
        fc_b=params["fc_b"][0][:, None],                      # (d, 1)
        fcs_wT=jnp.transpose(params["fcs_w"], (0, 2, 1)).reshape(M * Cout, -1),  # (M*Cout, d)
        fcs_b=params["fcs_b"].reshape(M * Cout, 1),
    )


def skconv_x(x_nchw, params, M, G, B_tile=None, compute_dtype=jnp.float32):
    N, Cin, H, W = x_nchw.shape
    Cout = params["fcs_w"].shape[2]
    d = params["fc_w"].shape[1]
    k_max = 1 + 2 * (M - 1)
    p_max = M - 1
    HW = H * W

    if B_tile is None:
        # Amortize the ~0.35 us/step pipeline overhead by widening the matmul
        # lane dim to B_tile*HW; on v7x prefer >= 2 grid steps for the 2 TCs.
        B_tile = next(c for c in (16, 8, 4, 2, 1) if c <= N and N % c == 0)
    assert N % B_tile == 0, "B_tile must divide the batch size"

    kp = _prepare_kernel_params(params, M, G, B_tile, HW)
    w_all = kp["w_all"].astype(compute_dtype)                 # bf16 option for big Cin/Cout
    patches = _im2col(x_nchw, k_max, p_max, compute_dtype)    # (KK*Cin, N*HW), lane-dense

    # pad the contraction dim to a sublane multiple (zero rows/cols -> exact)
    KKCin = patches.shape[0]
    pad_rows = (-KKCin) % 8
    if pad_rows:
        patches = jnp.pad(patches, ((0, pad_rows), (0, 0)))
        w_all = jnp.pad(w_all, ((0, 0), (0, pad_rows)))
    KKCin_p = KKCin + pad_rows

    kernel = _make_skconv_kernel(M, Cout, B_tile, HW)

    def const_spec(shape):
        nd = len(shape)
        # NOTE: pipeline_mode=pl.Buffered(1) on these grid-invariant blocks
        # would drop their (pointless) double-buffering; left at the default
        # for maximum cross-version compatibility.
        return pl.BlockSpec(shape, lambda n, _nd=nd: (0,) * _nd)

    in_specs = [
        pl.BlockSpec((KKCin_p, B_tile * HW), lambda n: (0, n)),   # lane-dense im2col block
        const_spec(w_all.shape),
        const_spec(kp["bn_scale"].shape),
        const_spec(kp["bn_bias"].shape),
        const_spec(kp["pool"].shape),
        const_spec(kp["expand"].shape),
        const_spec(kp["fc_wT"].shape),
        const_spec(kp["fc_b"].shape),
        const_spec(kp["fcs_wT"].shape),
        const_spec(kp["fcs_b"].shape),
    ]

    # ---- explicit VMEM budget (sized against v7x's 64 MiB part) -------------
    itemsize = jnp.dtype(compute_dtype).itemsize
    const_bytes = 4 * sum(int(kp[k].size) for k in
                          ("bn_scale", "bn_bias", "pool", "expand",
                           "fc_wT", "fc_b", "fcs_wT", "fcs_b"))
    const_bytes += itemsize * int(w_all.size)
    vmem_bytes = (2 * KKCin_p * B_tile * HW * itemsize        # double-buffered input blocks
                  + 2 * B_tile * Cout * HW * 4                # double-buffered output blocks
                  + M * Cout * B_tile * HW * 4                # feas scratch
                  + 2 * const_bytes)                          # (double-buffered) constants
    assert vmem_bytes < 48 * 1024 * 1024, (
        f"estimated VMEM {vmem_bytes / 2**20:.1f} MiB exceeds v7x budget; lower B_tile")
    vmem_limit = int(min(max(2 * vmem_bytes, 32 * 1024 * 1024), 48 * 1024 * 1024))

    # advisory cost estimate so XLA schedules the surrounding pad/slice ops nicely
    flops = 2 * (M * Cout) * KKCin_p * (N * HW)               # fused branch convs
    flops += 2 * (M * Cout) * B_tile * (N * HW)               # GAP pooling matmul
    flops += 2 * M * Cout * B_tile * (N * HW)                 # attention expansion matmuls
    flops += 2 * N * (Cout * d + M * d * Cout)                # squeeze / excite
    bytes_accessed = (itemsize * int(patches.size) + 4 * N * Cout * HW + const_bytes)
    cost = pl.CostEstimate(flops=int(flops),
                           transcendentals=int(N * M * Cout),
                           bytes_accessed=int(bytes_accessed))

    out = pl.pallas_call(
        kernel,
        out_shape=jax.ShapeDtypeStruct((N, Cout, HW), jnp.float32),
        grid=(N // B_tile,),
        in_specs=in_specs,
        out_specs=pl.BlockSpec((B_tile, Cout, HW), lambda n: (n, 0, 0)),
        scratch_shapes=[pltpu.VMEM((M * Cout, B_tile * HW), jnp.float32)],
        compiler_params=pltpu.CompilerParams(
            dimension_semantics=("parallel",),                # megacore / v7x: shard batch blocks
            vmem_limit_bytes=vmem_limit),
        cost_estimate=cost,
    )(patches, w_all, kp["bn_scale"], kp["bn_bias"], kp["pool"], kp["expand"],
      kp["fc_wT"], kp["fc_b"], kp["fcs_wT"], kp["fcs_b"])

    # (N, Cout, H*W) is NCHW flattened -> free reshape, no transpose needed
    return out.reshape(N, Cout, H, W)


def init_params(key, Cin, Cout, M, G, r, L):
    d = max(int(Cin / r), L)
    CinG = Cin // G
    ks = jax.random.split(key, 6)
    kcw = jax.random.split(ks[0], M)
    kcb = jax.random.split(ks[1], M)
    kbn = jax.random.split(ks[2], M)

    conv_w, bn_scale, bn_bias = [], [], []
    for i in range(M):
        k = 1 + 2 * i
        w = 0.3 * jax.random.normal(kcw[i], (k, k, CinG, Cout), jnp.float32)
        cb = 0.1 * jax.random.normal(kcb[i], (Cout,), jnp.float32)
        kb = jax.random.split(kbn[i], 4)
        gamma = 1.0 + 0.1 * jax.random.normal(kb[0], (Cout,), jnp.float32)
        beta = 0.1 * jax.random.normal(kb[1], (Cout,), jnp.float32)
        mean = 0.1 * jax.random.normal(kb[2], (Cout,), jnp.float32)
        var = jnp.abs(jax.random.normal(kb[3], (Cout,), jnp.float32)) + 0.5
        scale = gamma / jnp.sqrt(var + 1e-5)
        bias = scale * (cb - mean) + beta                     # fold conv-bias + eval-mode BN
        conv_w.append(w)
        bn_scale.append(scale)
        bn_bias.append(bias)

    fc_w = 0.3 * jax.random.normal(ks[3], (Cout, d), jnp.float32)
    fc_b = 0.1 * jax.random.normal(ks[4], (1, d), jnp.float32)
    kfcs = jax.random.split(ks[5], 2)
    fcs_w = 0.3 * jax.random.normal(kfcs[0], (M, d, Cout), jnp.float32)
    fcs_b = 0.1 * jax.random.normal(kfcs[1], (M, Cout), jnp.float32)

    return dict(conv_w=conv_w, bn_scale=jnp.stack(bn_scale),
                bn_bias=jnp.stack(bn_bias), fc_w=fc_w, fc_b=fc_b,
                fcs_w=fcs_w, fcs_b=fcs_b), d


def ref_forward(x_nchw, params, M, G):
    """Pure-JAX reference (same eval-mode-BN semantics) for verification."""
    x = jnp.transpose(x_nchw, (0, 2, 3, 1)).astype(jnp.float32)
    feas = []
    for i in range(M):
        p = i
        out = lax.conv_general_dilated(
            x, params["conv_w"][i], window_strides=(1, 1),
            padding=[(p, p), (p, p)],
            dimension_numbers=("NHWC", "HWIO", "NHWC"),
            feature_group_count=G)
        out = out * params["bn_scale"][i] + params["bn_bias"][i]
        out = jnp.where(out >= 0, out, 0.2 * out)
        feas.append(out)
    feas = jnp.stack(feas, axis=1)                            # (N, M, H, W, C)
    fea_U = feas.sum(axis=1)
    fea_s = fea_U.mean(axis=(1, 2))                           # (N, C)
    z = fea_s @ params["fc_w"] + params["fc_b"][0]            # (N, d)
    logits = jnp.stack([z @ params["fcs_w"][i] + params["fcs_b"][i]
                        for i in range(M)], axis=1)           # (N, M, C)
    att = jax.nn.softmax(logits, axis=1)
    fea_v = (feas * att[:, :, None, None, :]).sum(axis=1)
    return jnp.transpose(fea_v, (0, 3, 1, 2))                 # NCHW


if __name__ == "__main__":
    # small shapes consistent with the module
    in_features, out_features = 4, 8
    M, G, r, L = 2, 2, 2, 4
    N, H, W = 2, 16, 16

    key = jax.random.PRNGKey(0)
    kx, kparams = jax.random.split(key)
    x = jax.random.normal(kx, (N, in_features, H, W), dtype=jnp.float32)
    params, d = init_params(kparams, in_features, out_features, M, G, r, L)

    # B_tile = N: one fat grid step (matmul lane dim = N*HW) amortizes the
    # per-step pipeline overhead.  For larger batches on v7x, pass B_tile <= N/2
    # so the grid keeps >= 2 steps to feed both TensorCores.
    # TODO(synk): training-mode BatchNorm (batch statistics) is not implemented;
    # the kernel folds eval-mode running stats into a per-channel scale/bias.
    out = skconv_x(x, params, M, G, B_tile=N)
    out = jax.block_until_ready(out)

    ref = ref_forward(x, params, M, G)
    err = float(jnp.max(jnp.abs(out - ref)))
    assert jnp.allclose(out, ref, atol=1e-4, rtol=1e-4), f"max abs err {err}"
    print("KERNEL_OK")
</pallas_src>

<mosaic_0001>
module attributes {stable_mosaic.version = 11 : i64} {
  func.func @kernel(%arg0: i32, %arg1: memref<40x512xf32, #tpu.memory_space<vmem>>, %arg2: memref<16x40xf32, #tpu.memory_space<vmem>>, %arg3: memref<16x1xf32, #tpu.memory_space<vmem>>, %arg4: memref<16x1xf32, #tpu.memory_space<vmem>>, %arg5: memref<512x2xf32, #tpu.memory_space<vmem>>, %arg6: memref<2x512xf32, #tpu.memory_space<vmem>>, %arg7: memref<4x8xf32, #tpu.memory_space<vmem>>, %arg8: memref<4x1xf32, #tpu.memory_space<vmem>>, %arg9: memref<16x4xf32, #tpu.memory_space<vmem>>, %arg10: memref<16x1xf32, #tpu.memory_space<vmem>>, %arg11: memref<2x8x256xf32, #tpu.memory_space<vmem>>, %arg12: memref<16x512xf32, #tpu.memory_space<vmem>>) attributes {dimension_semantics = [#tpu.dimension_semantics<parallel>], iteration_bounds = array<i64: 1>, scalar_prefetch = 0 : i64, scratch_operands = 1 : i64, tpu.core_type = #tpu.core_type<tc>, window_params = [{transform_indices = @transform_0, window_bounds = array<i64: 40, 512>}, {pipeline_mode = #tpu.pipeline_mode<synchronous>, transform_indices = @transform_1, window_bounds = array<i64: 16, 40>}, {pipeline_mode = #tpu.pipeline_mode<synchronous>, transform_indices = @transform_2, window_bounds = array<i64: 16, 1>}, {pipeline_mode = #tpu.pipeline_mode<synchronous>, transform_indices = @transform_3, window_bounds = array<i64: 16, 1>}, {pipeline_mode = #tpu.pipeline_mode<synchronous>, transform_indices = @transform_4, window_bounds = array<i64: 512, 2>}, {pipeline_mode = #tpu.pipeline_mode<synchronous>, transform_indices = @transform_5, window_bounds = array<i64: 2, 512>}, {pipeline_mode = #tpu.pipeline_mode<synchronous>, transform_indices = @transform_6, window_bounds = array<i64: 4, 8>}, {pipeline_mode = #tpu.pipeline_mode<synchronous>, transform_indices = @transform_7, window_bounds = array<i64: 4, 1>}, {pipeline_mode = #tpu.pipeline_mode<synchronous>, transform_indices = @transform_8, window_bounds = array<i64: 16, 4>}, {pipeline_mode = #tpu.pipeline_mode<synchronous>, transform_indices = @transform_9, window_bounds = array<i64: 16, 1>}, {transform_indices = @transform_10, window_bounds = array<i64: 2, 8, 256>}]} {
    %c0 = arith.constant 0 : index
    %c0_0 = arith.constant 0 : index
    %0 = vector.load %arg2[%c0, %c0_0] : memref<16x40xf32, #tpu.memory_space<vmem>>, vector<16x40xf32>
    %c0_1 = arith.constant 0 : index
    %c0_2 = arith.constant 0 : index
    %1 = vector.load %arg1[%c0_1, %c0_2] : memref<40x512xf32, #tpu.memory_space<vmem>>, vector<40x512xf32>
    %cst = arith.constant dense<0.000000e+00> : vector<16x512xf32>
    %2 = tpu.matmul %0, %1, %cst {dimension_numbers = #tpu.dot_dimension_numbers<[1], [0], [0], [1], [0, 0, 1, 1], [], []>} : vector<16x40xf32>, vector<40x512xf32>, vector<16x512xf32> -> vector<16x512xf32>
    %c0_3 = arith.constant 0 : index
    %c0_4 = arith.constant 0 : index
    %3 = vector.load %arg3[%c0_3, %c0_4] : memref<16x1xf32, #tpu.memory_space<vmem>>, vector<16x1xf32>
    %4 = vector.broadcast %3 : vector<16x1xf32> to vector<16x512xf32>
    %5 = arith.mulf %2, %4 : vector<16x512xf32>
    %c0_5 = arith.constant 0 : index
    %c0_6 = arith.constant 0 : index
    %6 = vector.load %arg4[%c0_5, %c0_6] : memref<16x1xf32, #tpu.memory_space<vmem>>, vector<16x1xf32>
    %7 = vector.broadcast %6 : vector<16x1xf32> to vector<16x512xf32>
    %8 = arith.addf %5, %7 : vector<16x512xf32>
    %cst_7 = arith.constant 0.000000e+00 : f32
    %9 = vector.broadcast %cst_7 : f32 to vector<16x512xf32>
    %10 = arith.cmpf oge, %8, %9 : vector<16x512xf32>
    %cst_8 = arith.constant 2.000000e-01 : f32
    %11 = vector.broadcast %cst_8 : f32 to vector<16x512xf32>
    %12 = arith.mulf %11, %8 : vector<16x512xf32>
    %13 = arith.select %10, %8, %12 : vector<16x512xi1>, vector<16x512xf32>
    %c0_9 = arith.constant 0 : index
    %c0_10 = arith.constant 0 : index
    %14 = vector.load %arg12[%c0_9, %c0_10] : memref<16x512xf32, #tpu.memory_space<vmem>>, vector<16x512xf32>
    tpu.vector_store %arg12[%c0_9, %c0_10], %13 {strides = array<i32>} : memref<16x512xf32, #tpu.memory_space<vmem>>, vector<16x512xf32>,
    %c0_11 = arith.constant 0 : index
    %c0_12 = arith.constant 0 : index
    %15 = vector.load %arg5[%c0_11, %c0_12] : memref<512x2xf32, #tpu.memory_space<vmem>>, vector<512x2xf32>
    %cst_13 = arith.constant dense<0.000000e+00> : vector<16x2xf32>
    %16 = tpu.matmul %13, %15, %cst_13 {dimension_numbers = #tpu.dot_dimension_numbers<[1], [0], [0], [1], [0, 0, 1, 1], [], []>} : vector<16x512xf32>, vector<512x2xf32>, vector<16x2xf32> -> vector<16x2xf32>
    %17 = vector.extract_strided_slice %16 {offsets = [0, 0], sizes = [8, 2], strides = [1, 1]} : vector<16x2xf32> to vector<8x2xf32>
    %18 = vector.extract_strided_slice %16 {offsets = [8, 0], sizes = [8, 2], strides = [1, 1]} : vector<16x2xf32> to vector<8x2xf32>
    %19 = arith.addf %17, %18 : vector<8x2xf32>
    %c0_14 = arith.constant 0 : index
    %c0_15 = arith.constant 0 : index
    %20 = vector.load %arg7[%c0_14, %c0_15] : memref<4x8xf32, #tpu.memory_space<vmem>>, vector<4x8xf32>
    %cst_16 = arith.constant dense<0.000000e+00> : vector<4x2xf32>
    %21 = tpu.matmul %20, %19, %cst_16 {dimension_numbers = #tpu.dot_dimension_numbers<[1], [0], [0], [1], [0, 0, 1, 1], [], []>} : vector<4x8xf32>, vector<8x2xf32>, vector<4x2xf32> -> vector<4x2xf32>
    %c0_17 = arith.constant 0 : index
    %c0_18 = arith.constant 0 : index
    %22 = vector.load %arg8[%c0_17, %c0_18] : memref<4x1xf32, #tpu.memory_space<vmem>>, vector<4x1xf32>
    %23 = vector.broadcast %22 : vector<4x1xf32> to vector<4x2xf32>
    %24 = arith.addf %21, %23 : vector<4x2xf32>
    %c0_19 = arith.constant 0 : index
    %c0_20 = arith.constant 0 : index
    %25 = vector.load %arg9[%c0_19, %c0_20] : memref<16x4xf32, #tpu.memory_space<vmem>>, vector<16x4xf32>
    %cst_21 = arith.constant dense<0.000000e+00> : vector<16x2xf32>
    %26 = tpu.matmul %25, %24, %cst_21 {dimension_numbers = #tpu.dot_dimension_numbers<[1], [0], [0], [1], [0, 0, 1, 1], [], []>} : vector<16x4xf32>, vector<4x2xf32>, vector<16x2xf32> -> vector<16x2xf32>
    %c0_22 = arith.constant 0 : index
    %c0_23 = arith.constant 0 : index
    %27 = vector.load %arg10[%c0_22, %c0_23] : memref<16x1xf32, #tpu.memory_space<vmem>>, vector<16x1xf32>
    %28 = vector.broadcast %27 : vector<16x1xf32> to vector<16x2xf32>
    %29 = arith.addf %26, %28 : vector<16x2xf32>
    %30 = vector.extract_strided_slice %29 {offsets = [0, 0], sizes = [8, 2], strides = [1, 1]} : vector<16x2xf32> to vector<8x2xf32>
    %31 = vector.extract_strided_slice %29 {offsets = [8, 0], sizes = [8, 2], strides = [1, 1]} : vector<16x2xf32> to vector<8x2xf32>
    %32 = arith.maximumf %30, %31 : vector<8x2xf32>
    %33 = arith.subf %30, %32 : vector<8x2xf32>
    %34 = math.exp %33 : vector<8x2xf32>
    %35 = arith.subf %31, %32 : vector<8x2xf32>
    %36 = math.exp %35 : vector<8x2xf32>
    %37 = arith.addf %34, %36 : vector<8x2xf32>
    %cst_24 = arith.constant 1.000000e+00 : f32
    %38 = vector.broadcast %cst_24 : f32 to vector<8x2xf32>
    %39 = arith.divf %38, %37 : vector<8x2xf32>
    %c0_25 = arith.constant 0 : index
    %c0_26 = arith.constant 0 : index
    %40 = vector.load %arg6[%c0_25, %c0_26] : memref<2x512xf32, #tpu.memory_space<vmem>>, vector<2x512xf32>
    %cst_27 = arith.constant 0.000000e+00 : f32
    %41 = vector.broadcast %cst_27 : f32 to vector<8x512xf32>
    %42 = arith.mulf %34, %39 : vector<8x2xf32>
    %cst_28 = arith.constant dense<0.000000e+00> : vector<8x512xf32>
    %43 = tpu.matmul %42, %40, %cst_28 {dimension_numbers = #tpu.dot_dimension_numbers<[1], [0], [0], [1], [0, 0, 1, 1], [], []>} : vector<8x2xf32>, vector<2x512xf32>, vector<8x512xf32> -> vector<8x512xf32>
    %c0_29 = arith.constant 0 : index
    %c0_30 = arith.constant 0 : index
    %44 = vector.load %arg12[%c0_29, %c0_30] : memref<16x512xf32, #tpu.memory_space<vmem>>, vector<8x512xf32>
    %45 = arith.mulf %44, %43 : vector<8x512xf32>
    %46 = arith.addf %41, %45 : vector<8x512xf32>
    %47 = arith.mulf %36, %39 : vector<8x2xf32>
    %cst_31 = arith.constant dense<0.000000e+00> : vector<8x512xf32>
    %48 = tpu.matmul %47, %40, %cst_31 {dimension_numbers = #tpu.dot_dimension_numbers<[1], [0], [0], [1], [0, 0, 1, 1], [], []>} : vector<8x2xf32>, vector<2x512xf32>, vector<8x512xf32> -> vector<8x512xf32>
    %c8 = arith.constant 8 : index
    %c0_32 = arith.constant 0 : index
    %49 = vector.load %arg12[%c8, %c0_32] : memref<16x512xf32, #tpu.memory_space<vmem>>, vector<8x512xf32>
    %50 = arith.mulf %49, %48 : vector<8x512xf32>
    %51 = arith.addf %46, %50 : vector<8x512xf32>
    %52 = vector.extract_strided_slice %51 {offsets = [0, 0], sizes = [8, 256], strides = [1, 1]} : vector<8x512xf32> to vector<8x256xf32>
    %c0_33 = arith.constant 0 : index
    %c0_34 = arith.constant 0 : index
    %c0_35 = arith.constant 0 : index
    %53 = vector.load %arg11[%c0_33, %c0_34, %c0_35] : memref<2x8x256xf32, #tpu.memory_space<vmem>>, vector<1x8x256xf32>
    %54 = vector.shape_cast %53 : vector<1x8x256xf32> to vector<8x256xf32>
    %55 = vector.shape_cast %52 : vector<8x256xf32> to vector<1x8x256xf32>
    tpu.vector_store %arg11[%c0_33, %c0_34, %c0_35], %55 {strides = array<i32>} : memref<2x8x256xf32, #tpu.memory_space<vmem>>, vector<1x8x256xf32>,
    %56 = vector.extract_strided_slice %51 {offsets = [0, 256], sizes = [8, 256], strides = [1, 1]} : vector<8x512xf32> to vector<8x256xf32>
    %c1 = arith.constant 1 : index
    %c0_36 = arith.constant 0 : index
    %c0_37 = arith.constant 0 : index
    %57 = vector.load %arg11[%c1, %c0_36, %c0_37] : memref<2x8x256xf32, #tpu.memory_space<vmem>>, vector<1x8x256xf32>
    %58 = vector.shape_cast %57 : vector<1x8x256xf32> to vector<8x256xf32>
    %59 = vector.shape_cast %56 : vector<8x256xf32> to vector<1x8x256xf32>
    tpu.vector_store %arg11[%c1, %c0_36, %c0_37], %59 {strides = array<i32>} : memref<2x8x256xf32, #tpu.memory_space<vmem>>, vector<1x8x256xf32>,
    return
  }
  func.func @transform_0(%arg0: i32) -> (i32, i32) {
    %c0_i32 = arith.constant 0 : i32
    %c0_i32_0 = arith.constant 0 : i32
    return %c0_i32, %arg0 : i32, i32
  }
  func.func @transform_1(%arg0: i32) -> (i32, i32) {
    %c0_i32 = arith.constant 0 : i32
    %c0_i32_0 = arith.constant 0 : i32
    %c0_i32_1 = arith.constant 0 : i32
    return %c0_i32, %c0_i32_0 : i32, i32
  }
  func.func @transform_2(%arg0: i32) -> (i32, i32) {
    %c0_i32 = arith.constant 0 : i32
    %c0_i32_0 = arith.constant 0 : i32
    %c0_i32_1 = arith.constant 0 : i32
    return %c0_i32, %c0_i32_0 : i32, i32
  }
  func.func @transform_3(%arg0: i32) -> (i32, i32) {
    %c0_i32 = arith.constant 0 : i32
    %c0_i32_0 = arith.constant 0 : i32
    %c0_i32_1 = arith.constant 0 : i32
    return %c0_i32, %c0_i32_0 : i32, i32
  }
  func.func @transform_4(%arg0: i32) -> (i32, i32) {
    %c0_i32 = arith.constant 0 : i32
    %c0_i32_0 = arith.constant 0 : i32
    %c0_i32_1 = arith.constant 0 : i32
    return %c0_i32, %c0_i32_0 : i32, i32
  }
  func.func @transform_5(%arg0: i32) -> (i32, i32) {
    %c0_i32 = arith.constant 0 : i32
    %c0_i32_0 = arith.constant 0 : i32
    %c0_i32_1 = arith.constant 0 : i32
    return %c0_i32, %c0_i32_0 : i32, i32
  }
  func.func @transform_6(%arg0: i32) -> (i32, i32) {
    %c0_i32 = arith.constant 0 : i32
    %c0_i32_0 = arith.constant 0 : i32
    %c0_i32_1 = arith.constant 0 : i32
    return %c0_i32, %c0_i32_0 : i32, i32
  }
  func.func @transform_7(%arg0: i32) -> (i32, i32) {
    %c0_i32 = arith.constant 0 : i32
    %c0_i32_0 = arith.constant 0 : i32
    %c0_i32_1 = arith.constant 0 : i32
    return %c0_i32, %c0_i32_0 : i32, i32
  }
  func.func @transform_8(%arg0: i32) -> (i32, i32) {
    %c0_i32 = arith.constant 0 : i32
    %c0_i32_0 = arith.constant 0 : i32
    %c0_i32_1 = arith.constant 0 : i32
    return %c0_i32, %c0_i32_0 : i32, i32
  }
  func.func @transform_9(%arg0: i32) -> (i32, i32) {
    %c0_i32 = arith.constant 0 : i32
    %c0_i32_0 = arith.constant 0 : i32
    %c0_i32_1 = arith.constant 0 : i32
    return %c0_i32, %c0_i32_0 : i32, i32
  }
  func.func @transform_10(%arg0: i32) -> (i32, i32, i32) {
    %c0_i32 = arith.constant 0 : i32
    %c0_i32_0 = arith.constant 0 : i32
    %c0_i32_1 = arith.constant 0 : i32
    return %arg0, %c0_i32, %c0_i32_0 : i32, i32, i32
  }
}

</mosaic_0001>

<bundles_post_ra>
// kernel: tpu_custom_call.1
= control target key start
LH: loop header
LB: loop body
LE: loop exit
PB: predicated region body
PF: predicated region fallthrough
CT: control target
= control target key end

     0   :  { %vm58_vm0 = vcmask 326656   ;;  %v1212_v21 = vmov 0.0   ;;  %v1213_v25 = vmov 0   ;;  %s1624_s0 = inlined_call_operand.vmem [shape: f32[40,512], index: 0, kind: input, shape index: {}]   ;;  %s1625_s1 = inlined_call_operand.vmem [shape: f32[16,40], index: 1, kind: input, shape index: {}]   ;;  %s1626_s2 = inlined_call_operand.vmem [shape: f32[16,1], index: 2, kind: input, shape index: {}]   ;;  %s1627_s3 = inlined_call_operand.vmem [shape: f32[16,1], index: 3, kind: input, shape index: {}]   ;;  %s1628_s4 = inlined_call_operand.vmem [shape: f32[512,2], index: 4, kind: input, shape index: {}]   ;;  %s1629_s5 = inlined_call_operand.vmem [shape: f32[2,512], index: 5, kind: input, shape index: {}]   ;;  %s1630_s6 = inlined_call_operand.vmem [shape: f32[4,8], index: 6, kind: input, shape index: {}]   ;;  %s1631_s7 = inlined_call_operand.vmem [shape: f32[4,1], index: 7, kind: input, shape index: {}]   ;;  %s1632_s8 = inlined_call_operand.vmem [shape: f32[16,4], index: 8, kind: input, shape index: {}]   ;;  %s1633_s9 = inlined_call_operand.vmem [shape: f32[16,1], index: 9, kind: input, shape index: {}]   ;;  %s1634_s10 = inlined_call_operand.hbm [shape: f32[2,8,256], index: 10, kind: output, shape index: {}]  }
   0x1   :  { %v55_v0 = vld [vmem:[%s1624_s0 + $0x88] sm:$0xff]  ;;  %v57_v1 = vld [vmem:[%s1624_s0 + $0x98] sm:$0xff]  ;;  %v54_v2 = vld [vmem:[%s1624_s0 + $0x80] sm:$0xff]  ;;  %129 = vmatprep.mubr.f32.mxu0 %v1212_v21  ;;  %206 = vmatprep.mubr.f32.mxu1 %v1212_v21 }
   0x2   :  { %87 = vmatprep.subr.mxu0 %v55_v0  ;;  %164 = vmatprep.subr.mxu1 %v57_v1  ;;  %v56_v3 = vld [vmem:[%s1624_s0 + $0x90] sm:$0xff]  ;;  %v51_v4 = vld [vmem:[%s1624_s0 + $0x68] sm:$0xff]  ;;  %v53_v5 = vld [vmem:[%s1624_s0 + $0x78] sm:$0xff] }
   0x3   :  { %88 = vmatpush1.msra.mxu0 %v54_v2  ;;  %165 = vmatpush1.msra.mxu1 %v56_v3  ;;  %v50_v6 = vld [vmem:[%s1624_s0 + $0x60] sm:$0xff]  ;;  %v52_v7 = vld [vmem:[%s1624_s0 + $0x70] sm:$0xff]  ;;  %v47_v8 = vld [vmem:[%s1624_s0 + $0x48] sm:$0xff] }
   0x4   :  { %89 = vmatprep.subr.mxu0 %v51_v4  ;;  %166 = vmatprep.subr.mxu1 %v53_v5  ;;  %v49_v9 = vld [vmem:[%s1624_s0 + $0x58] sm:$0xff]  ;;  %v46_v10 = vld [vmem:[%s1624_s0 + $0x40] sm:$0xff]  ;;  %v48_v11 = vld [vmem:[%s1624_s0 + $0x50] sm:$0xff] }
   0x5   :  { %90 = vmatpush1.msra.mxu0 %v50_v6  ;;  %167 = vmatpush1.msra.mxu1 %v52_v7  ;;  %v43_v12 = vld [vmem:[%s1624_s0 + $0x28] sm:$0xff]  ;;  %v45_v13 = vld [vmem:[%s1624_s0 + $0x38] sm:$0xff]  ;;  %v42_v14 = vld [vmem:[%s1624_s0 + $0x20] sm:$0xff] }
   0x6   :  { %91 = vmatprep.subr.mxu0 %v47_v8  ;;  %168 = vmatprep.subr.mxu1 %v49_v9  ;;  %v44_v15 = vld [vmem:[%s1624_s0 + $0x30] sm:$0xff]  ;;  %v39_v16 = vld [vmem:[%s1624_s0 + $0x8] sm:$0xff]  ;;  %v41_v17 = vld [vmem:[%s1624_s0 + $0x18] sm:$0xff] }
   0x7   :  { %92 = vmatpush1.msra.mxu0 %v46_v10  ;;  %169 = vmatpush1.msra.mxu1 %v48_v11  ;;  %v38_v18 = vld [vmem:[%s1624_s0] sm:$0xff]  ;;  %v40_v19 = vld [vmem:[%s1624_s0 + $0x10] sm:$0xff]  ;;  %v220_v23 = vld [vmem:[%s1626_s2 + $0x8] sm:$0xff] }
   0x8   :  { %93 = vmatprep.subr.mxu0 %v43_v12  ;;  %170 = vmatprep.subr.mxu1 %v45_v13  ;;  %v36_v20 = vld [vmem:[%s1625_s1] sm:$0xff]  ;;  %v37_v24 = vld [vmem:[%s1625_s1 + $0x8] sm:$0xff]  ;;  %v322_v26 = vld [vmem:[%s1628_s4 + $0xf8] sm:$0xff] }
   0x9   :  { %94 = vmatpush1.msra.mxu0 %v42_v14  ;;  %171 = vmatpush1.msra.mxu1 %v44_v15  ;;  %v219_v22 = vld [vmem:[%s1626_s2] sm:$0xff]  ;;  %v354_v27 = vld [vmem:[%s1628_s4 + $0x1f8] sm:$0xff]  ;;  %v240_v31 = vld [vmem:[%s1627_s3 + $0x8] sm:$0xff] }
   0xa   :  { %95 = vmatprep.subr.mxu0 %v39_v16  ;;  %172 = vmatprep.subr.mxu1 %v41_v17  ;;  %v306_v28 = vld [vmem:[%s1628_s4 + $0x78] sm:$0xff]  ;;  %v239_v30 = vld [vmem:[%s1627_s3] sm:$0xff]  ;;  %v321_v32 = vld [vmem:[%s1628_s4 + $0xf0] sm:$0xff] }
   0xb   :  { %96 = vmatpush1.msra.mxu0 %v38_v18  ;;  %173 = vmatpush1.msra.mxu1 %v40_v19  ;;  %v338_v29 = vld [vmem:[%s1628_s4 + $0x178] sm:$0xff]  ;;  %v353_v33 = vld [vmem:[%s1628_s4 + $0x1f0] sm:$0xff]  ;;  %v320_v36 = vld [vmem:[%s1628_s4 + $0xe8] sm:$0xff] }
   0xc   :  { %1063 = vmatmul.mubr.msk.f32.vlgmr.msra.gmra.mxu0 %vm58_vm0, %v36_v20  ;;  %1065 = vmatmul.mubr.msk.f32.vlgmr.msra.gmra.mxu1 %vm58_vm0, %v36_v20  ;;  %v305_v34 = vld [vmem:[%s1628_s4 + $0x70] sm:$0xff]  ;;  %v352_v37 = vld [vmem:[%s1628_s4 + $0x1e8] sm:$0xff]  ;;  %v507_v38 = vld [vmem:[%s1631_s7] sm:$0xf] }
   0xd   :  { %135 = vmatprep.mubr.f32.mxu0 %v1212_v21  ;;  %212 = vmatprep.mubr.f32.mxu1 %v1212_v21  ;;  %v337_v35 = vld [vmem:[%s1628_s4 + $0x170] sm:$0xff]  ;;  %v589_v39 = vld [vmem:[%s1633_s9] sm:$0xff]  ;;  %v304_v40 = vld [vmem:[%s1628_s4 + $0x68] sm:$0xff] }
   0xe   :  { %1181 = vset.pattern.permute.xlu0 %v1213_v25  ;;  %1182 = vset.pattern.permute.xlu1 %v1213_v25  ;;  %v336_v41 = vld [vmem:[%s1628_s4 + $0x168] sm:$0xff]  ;;  %v319_v42 = vld [vmem:[%s1628_s4 + $0xe0] sm:$0xff] }
   0xf   :  { %223 = vperm.xlu0 %1181, %v219_v22   ;;  %228 = vperm.xlu1 %1182, %v220_v23   ;;  %v351_v43 = vld [vmem:[%s1628_s4 + $0x1e0] sm:$0xff] }
  0x10   :  { %1064 = vmatmul.mubr.msk.f32.gmra.mxu0 %vm58_vm0, %v37_v24  ;;  %1066 = vmatmul.mubr.msk.f32.gmra.mxu1 %vm58_vm0, %v37_v24  ;;  %v303_v44 = vld [vmem:[%s1628_s4 + $0x60] sm:$0xff] }
  0x11   :  { %1083 = vmatprep.subr.mxu0 %v322_v26  ;;  %1121 = vmatprep.subr.mxu1 %v354_v27  ;;  %v335_v45 = vld [vmem:[%s1628_s4 + $0x160] sm:$0xff] }
  0x12   :  { %1084 = vmatpush3.msra.mxu0 %v306_v28  ;;  %1122 = vmatpush3.msra.mxu1 %v338_v29 }
  0x13   :  { %243 = vperm.xlu0 %1181, %v239_v30   ;;  %248 = vperm.xlu1 %1182, %v240_v31  }
  0x14   :  { %1085 = vmatprep.subr.mxu0 %v321_v32  ;;  %1123 = vmatprep.subr.mxu1 %v353_v33 }
  0x15   :  { %1086 = vmatpush3.msra.mxu0 %v305_v34  ;;  %1124 = vmatpush3.msra.mxu1 %v337_v35 }
  0x16   :  { %1087 = vmatprep.subr.mxu0 %v320_v36  ;;  %1125 = vmatprep.subr.mxu1 %v352_v37 }
  0x17   :  { %510 = vperm.xlu0 %1181, %v507_v38   ;;  %593 = vperm.xlu1 %1182, %v589_v39  }
  0x18   :  { %15 = vsyncpa [#allocation4], 0  ;;  %v590_v46 = vld [vmem:[%s1633_s9 + $0x8] sm:$0xff]  ;;  %1088 = vmatpush3.msra.mxu0 %v304_v40  ;;  %1126 = vmatpush3.msra.mxu1 %v336_v41  ;;  %v318_v47 = vld [vmem:[%s1628_s4 + $0xd8] sm:$0xff]  ;;  %vm1214_vm9 = vmmov 0   ;;  %vm513_vm10 = vcmask 64512  }
  0x19   :  { %1089 = vmatprep.subr.mxu0 %v319_v42  ;;  %1127 = vmatprep.subr.mxu1 %v351_v43  ;;  %v350_v48 = vld [vmem:[%s1628_s4 + $0x1d8] sm:$0xff]  ;;  %v317_v51 = vld [vmem:[%s1628_s4 + $0xd0] sm:$0xff]  ;;  %v316_v55 = vld [vmem:[%s1628_s4 + $0xc8] sm:$0xff]  ;;  %vm601_vm11 = vcmask 31744   ;;  %vm608_vm12 = vcmask 1043456   ;;  %vm721_vm13 = vcmask 1041408  }
  0x1a   :  { %v302_v49 = vld [vmem:[%s1628_s4 + $0x58] sm:$0xff]  ;;  %1090 = vmatpush3.msra.mxu0 %v303_v44  ;;  %1128 = vmatpush3.msra.mxu1 %v335_v45  ;;  %v349_v52 = vld [vmem:[%s1628_s4 + $0x1d0] sm:$0xff]  ;;  %v348_v56 = vld [vmem:[%s1628_s4 + $0x1c8] sm:$0xff]  ;;  %vm717_vm14 = vcmask 15360  }
  0x1b   :  { %v334_v50 = vld [vmem:[%s1628_s4 + $0x158] sm:$0xff]  ;;  %598 = vperm.xlu0 %1181, %v590_v46   ;;  %1091 = vmatprep.subr.mxu0 %v318_v47  ;;  %v301_v53 = vld [vmem:[%s1628_s4 + $0x50] sm:$0xff]  ;;  %v300_v57 = vld [vmem:[%s1628_s4 + $0x48] sm:$0xff] }
  0x1c   :  { %1129 = vmatprep.subr.mxu1 %v350_v48  ;;  %1092 = vmatpush3.msra.mxu0 %v302_v49  ;;  %v333_v54 = vld [vmem:[%s1628_s4 + $0x150] sm:$0xff]  ;;  %v332_v58 = vld [vmem:[%s1628_s4 + $0x148] sm:$0xff]  ;;  %v315_v59 = vld [vmem:[%s1628_s4 + $0xc0] sm:$0xff] }
  0x1d   :  { %1130 = vmatpush3.msra.mxu1 %v334_v50  ;;  %1093 = vmatprep.subr.mxu0 %v317_v51  ;;  %v347_v60 = vld [vmem:[%s1628_s4 + $0x1c0] sm:$0xff]  ;;  %v314_v63 = vld [vmem:[%s1628_s4 + $0xb8] sm:$0xff]  ;;  %v313_v3 = vld [vmem:[%s1628_s4 + $0xb0] sm:$0xff] }
  0x1e   :  { %1131 = vmatprep.subr.mxu1 %v349_v52  ;;  %1094 = vmatpush3.msra.mxu0 %v301_v53  ;;  %v299_v61 = vld [vmem:[%s1628_s4 + $0x40] sm:$0xff]  ;;  %v346_v0 = vld [vmem:[%s1628_s4 + $0x1b8] sm:$0xff]  ;;  %v345_v4 = vld [vmem:[%s1628_s4 + $0x1b0] sm:$0xff] }
  0x1f   :  { %1132 = vmatpush3.msra.mxu1 %v333_v54  ;;  %1095 = vmatprep.subr.mxu0 %v316_v55  ;;  %v331_v62 = vld [vmem:[%s1628_s4 + $0x140] sm:$0xff]  ;;  %v298_v1 = vld [vmem:[%s1628_s4 + $0x38] sm:$0xff]  ;;  %v297_v5 = vld [vmem:[%s1628_s4 + $0x30] sm:$0xff] }
  0x20   :  { %1133 = vmatprep.subr.mxu1 %v348_v56  ;;  %1096 = vmatpush3.msra.mxu0 %v300_v57  ;;  %v330_v2 = vld [vmem:[%s1628_s4 + $0x138] sm:$0xff]  ;;  %v329_v6 = vld [vmem:[%s1628_s4 + $0x130] sm:$0xff]  ;;  %v312_v7 = vld [vmem:[%s1628_s4 + $0xa8] sm:$0xff] }
  0x21   :  { %1134 = vmatpush3.msra.mxu1 %v332_v58  ;;  %1097 = vmatprep.subr.mxu0 %v315_v59  ;;  %v344_v8 = vld [vmem:[%s1628_s4 + $0x1a8] sm:$0xff]  ;;  %v311_v11 = vld [vmem:[%s1628_s4 + $0xa0] sm:$0xff]  ;;  %v310_v15 = vld [vmem:[%s1628_s4 + $0x98] sm:$0xff] }
  0x22   :  { %1135 = vmatprep.subr.mxu1 %v347_v60  ;;  %1098 = vmatpush3.msra.mxu0 %v299_v61  ;;  %v296_v9 = vld [vmem:[%s1628_s4 + $0x28] sm:$0xff]  ;;  %v343_v12 = vld [vmem:[%s1628_s4 + $0x1a0] sm:$0xff]  ;;  %v342_v16 = vld [vmem:[%s1628_s4 + $0x198] sm:$0xff] }
  0x23   :  { %1136 = vmatpush3.msra.mxu1 %v331_v62  ;;  %1099 = vmatprep.subr.mxu0 %v314_v63  ;;  %v328_v10 = vld [vmem:[%s1628_s4 + $0x128] sm:$0xff]  ;;  %v295_v13 = vld [vmem:[%s1628_s4 + $0x20] sm:$0xff]  ;;  %v294_v17 = vld [vmem:[%s1628_s4 + $0x18] sm:$0xff] }
  0x24   :  { %1137 = vmatprep.subr.mxu1 %v346_v0  ;;  %1100 = vmatpush3.msra.mxu0 %v298_v1  ;;  %v327_v14 = vld [vmem:[%s1628_s4 + $0x120] sm:$0xff]  ;;  %v326_v18 = vld [vmem:[%s1628_s4 + $0x118] sm:$0xff]  ;;  %v309_v19 = vld [vmem:[%s1628_s4 + $0x90] sm:$0xff] }
  0x25   :  { %1138 = vmatpush3.msra.mxu1 %v330_v2  ;;  %1101 = vmatprep.subr.mxu0 %v313_v3  ;;  %v341_v20 = vld [vmem:[%s1628_s4 + $0x190] sm:$0xff]  ;;  %v308_v24 = vld [vmem:[%s1628_s4 + $0x88] sm:$0xff]  ;;  %v307_v28 = vld [vmem:[%s1628_s4 + $0x80] sm:$0xff] }
  0x26   :  { %1139 = vmatprep.subr.mxu1 %v345_v4  ;;  %1102 = vmatpush3.msra.mxu0 %v297_v5  ;;  %v293_v22 = vld [vmem:[%s1628_s4 + $0x10] sm:$0xff]  ;;  %v340_v25 = vld [vmem:[%s1628_s4 + $0x188] sm:$0xff]  ;;  %v339_v29 = vld [vmem:[%s1628_s4 + $0x180] sm:$0xff] }
  0x27   :  { %1140 = vmatpush3.msra.mxu1 %v329_v6  ;;  %1103 = vmatprep.subr.mxu0 %v312_v7  ;;  %v325_v23 = vld [vmem:[%s1628_s4 + $0x110] sm:$0xff]  ;;  %v292_v26 = vld [vmem:[%s1628_s4 + $0x8] sm:$0xff]  ;;  %v291_v30 = vld [vmem:[%s1628_s4] sm:$0xff] }
  0x28   :  { %1141 = vmatprep.subr.mxu1 %v344_v8  ;;  %1104 = vmatpush3.msra.mxu0 %v296_v9  ;;  %v324_v27 = vld [vmem:[%s1628_s4 + $0x108] sm:$0xff]  ;;  %v323_v31 = vld [vmem:[%s1628_s4 + $0x100] sm:$0xff] }
  0x29   :  { %1142 = vmatpush3.msra.mxu1 %v328_v10  ;;  %1105 = vmatprep.subr.mxu0 %v311_v11 }
  0x2a   :  { %1143 = vmatprep.subr.mxu1 %v343_v12  ;;  %1106 = vmatpush3.msra.mxu0 %v295_v13 }
  0x2b   :  { %1144 = vmatpush3.msra.mxu1 %v327_v14  ;;  %1107 = vmatprep.subr.mxu0 %v310_v15 }
  0x2c   :  { %1145 = vmatprep.subr.mxu1 %v342_v16  ;;  %1108 = vmatpush3.msra.mxu0 %v294_v17 }
  0x2d   :  { %1146 = vmatpush3.msra.mxu1 %v326_v18  ;;  %1109 = vmatprep.subr.mxu0 %v309_v19 }
  0x2e   :  { %1147 = vmatprep.subr.mxu1 %v341_v20  ;;  %1110 = vmatpush3.msra.mxu0 %v293_v22 }
  0x2f   :  { %1148 = vmatpush3.msra.mxu1 %v325_v23  ;;  %1111 = vmatprep.subr.mxu0 %v308_v24 }
  0x30   :  { %1149 = vmatprep.subr.mxu1 %v340_v25  ;;  %1112 = vmatpush3.msra.mxu0 %v292_v26 }
  0x31   :  { %1150 = vmatpush3.msra.mxu1 %v324_v27  ;;  %1113 = vmatprep.subr.mxu0 %v307_v28  ;;  %v506_v28 = vld [vmem:[%s1630_s6] sm:$0xf] }
  0x32   :  { %1151 = vmatprep.subr.mxu1 %v339_v29  ;;  %1114 = vmatpush3.msra.mxu0 %v291_v30  ;;  %v587_v29 = vld [vmem:[%s1632_s8] sm:$0xff] }
  0x33   :  { %1152 = vmatpush3.msra.mxu1 %v323_v31  ;;  %1164 = vmatprep.subr.mxu0 %v1212_v21 }
  0x8a   :  { %v224_v32 = vpop.permute.xlu0 %223  ;;  %v229_v36 = vpop.permute.xlu1 %228 }
  0x8e   :  { %v244_v35 = vpop.permute.xlu0 %243  ;;  %v249_v54 = vpop.permute.xlu1 %248 }
  0x92   :  { %v511_v30 = vpop.permute.xlu0 %510 }
  0xcc   :  { %v131_v33 = vpop.f32.mrf.mxu0  ;;  %v208_v34 = vpop.f32.mrf.mxu1 }
  0xcd   :  { %v231_v37 = vmul.f32 %v224_v32, %v131_v33  ;;  %v233_v38 = vmul.f32 %v224_v32, %v208_v34  ;;  %v588_v34 = vld [vmem:[%s1632_s8 + $0x8] sm:$0xff] }
  0xce   :  { %v133_v39 = vpop.f32.mrf.mxu0  ;;  %v210_v40 = vpop.f32.mrf.mxu1 }
  0xcf   :  { %v251_v41 = vadd.f32 %v244_v35, %v231_v37  ;;  %v253_v42 = vadd.f32 %v244_v35, %v233_v38  ;;  %v232_v43 = vmul.f32 %v224_v32, %v133_v39  ;;  %v234_v44 = vmul.f32 %v224_v32, %v210_v40 }
  0xd0   :  { %v137_v45 = vpop.f32.mrf.mxu0  ;;  %v214_v46 = vpop.f32.mrf.mxu1  ;;  %v1215_v37 = vmov 1983009808  }
  0xd1   :  { %vm259_vm1 = vcmp.ge.f32.partialorder %v251_v41, 0.0  ;;  %v267_v47 = vmul.f32 0.2, %v251_v41  ;;  %v252_v48 = vadd.f32 %v244_v35, %v232_v43  ;;  %v254_v49 = vadd.f32 %v244_v35, %v234_v44  ;;  %v697_v35 = vld [vmem:[%s1629_s5] sm:$0xff]  ;;  %s1216_s5 = smov [#allocation3]  }
  0xd2   :  { %v235_v50 = vmul.f32 %v229_v36, %v137_v45  ;;  %v237_v51 = vmul.f32 %v229_v36, %v214_v46  ;;  %v139_v52 = vpop.f32.mrf.mxu0  ;;  %v216_v53 = vpop.f32.mrf.mxu1  ;;  %vm261_vm2 = vcmp.ge.f32.partialorder %v253_v42, 0.0  ;;  %v269_v55 = vmul.f32 0.2, %v253_v42  ;;  %s1052_s8 = sshll.u32 %s1216_s5, 4  ;;  %s1053_s8 = int_to_ptr.vmem [resolvable:$true] %s1052_s8 }
  0xd3   :  { %v236_v56 = vmul.f32 %v229_v36, %v139_v52  ;;  %v238_v57 = vmul.f32 %v229_v36, %v216_v53  ;;  %vm260_vm3 = vcmp.ge.f32.partialorder %v252_v48, 0.0  ;;  %v268_v60 = vmul.f32 0.2, %v252_v48  ;;  %s1190_s13 = scalar_lea.vmem %s1053_s8, 512  ;;  %p1195_p1 = scmp.lt.s32.totalorder %s1053_s8, %s1053_s8 }
  0xd4   :  { %v255_v58 = vadd.f32 %v249_v54, %v235_v50  ;;  %v257_v59 = vadd.f32 %v249_v54, %v237_v51  ;;  %vm262_vm4 = vcmp.ge.f32.partialorder %v254_v49, 0.0  ;;  %v270_v63 = vmul.f32 0.2, %v254_v49  ;;  %p1191_p0 = scmp.ne.s32.totalorder %s1053_s8, %s1190_s13  ;;  %p1196_p2 = scmp.lt.s32.totalorder %s1190_s13, %s1190_s13 }
  0xd5   :  { %v256_v61 = vadd.f32 %v249_v54, %v236_v56  ;;  %v258_v62 = vadd.f32 %v249_v54, %v238_v57  ;;  %v1562_v0 = vsel %vm260_vm3, %v252_v48, %v268_v60  ;;  %v1565_v1 = vsel %vm259_vm1, %v251_v41, %v267_v47  ;;  %v594_v48 = vpop.permute.xlu1 %593 }
  0xd6   :  { %v271_v2 = vmul.f32 0.2, %v255_v58  ;;  %419 = vmatprep.mubr.f32.mxu0 %v1562_v0  ;;  %v1568_v3 = vsel %vm262_vm4, %v254_v49, %v270_v63  ;;  %v1573_v5 = vsel %vm261_vm2, %v253_v42, %v269_v55  ;;  %vm263_vm7 = vcmp.ge.f32.partialorder %v255_v58, 0.0  ;;  %v599_v49 = vpop.permute.xlu0 %598  ;;  %p1197_p3 = por %p1196_p2, %p1195_p1 }
  0xd7   :  { %vm264_vm5 = vcmp.ge.f32.partialorder %v256_v61, 0.0  ;;  %v272_v4 = vmul.f32 0.2, %v256_v61  ;;  %vm266_vm6 = vcmp.ge.f32.partialorder %v258_v62, 0.0  ;;  %494 = vmatprep.mubr.f32.mxu1 %v1568_v3  ;;  %420 = vmatmul.mubr.f32.vlgmr.msra.gmra.mxu0 %v1565_v1  ;;  %v274_v6 = vmul.f32 0.2, %v258_v62 }
  0xd8   :  { %v273_v7 = vmul.f32 0.2, %v257_v59  ;;  %495 = vmatmul.mubr.f32.vlgmr.msra.gmra.mxu1 %v1573_v5  ;;  %vm265_vm8 = vcmp.ge.f32.partialorder %v257_v59, 0.0  ;;  %v1582_v10 = vsel %vm263_vm7, %v255_v58, %v271_v2  ;;  %v704_v36 = vlaneseq  ;;  %p1198_p4 = pnand %p1197_p3, %p1191_p0 }
  0xd9   :  { %v1576_v8 = vsel %vm264_vm5, %v256_v61, %v272_v4  ;;  %v1579_v9 = vsel %vm266_vm6, %v258_v62, %v274_v6  ;;  %v702_v38 = vunpack.c.l.s4 %v1215_v37  ;;  %v700_v41 = vcombine.high %v697_v35, %v697_v35 }
  0xda   :  { %424 = vmatprep.mubr.f32.mxu0 %v1576_v8  ;;  %499 = vmatprep.mubr.f32.mxu1 %v1579_v9  ;;  %v1585_v11 = vsel %vm265_vm8, %v257_v59, %v273_v7  ;;  %v705_v39 = vshrl.u32 %v704_v36, 7 }
  0xdb   :  { %425 = vmatmul.mubr.f32.gmra.mxu0 %v1582_v10  ;;  %v703_v40 = vunpack.c.0.s8 %v702_v38 }
  0xdc   :  { %500 = vmatmul.mubr.f32.gmra.mxu1 %v1585_v11  ;;  %1166 = vmatprep.mubr.msk.f32.mxu0 %vm1214_vm9, %v1212_v21 }
  0xdd   :  { %1171 = vmatprep.mubr.msk.f32.mxu1 %vm601_vm11, %v587_v29  ;;  %v706_v42 = vsub.s32 %v703_v40, %v705_v39 }
  0xdf   :  { %v707_v43 = vrot.slane %v697_v35, %v706_v42  ;;  %v714_v44 = vrot.slane %v700_v41, %v706_v42 }
  0xe1   :  { %v715_v45 = vcombine.high %v707_v43, %v707_v43  ;;  %v716_v46 = vcombine.high %v714_v44, %v714_v44 }
 0x197   :  { %v1115_v12 = vpop.f32.mrf.mxu0 }
 0x198   :  { %v1153_v13 = vpop.f32.mrf.mxu1 }
 0x199   :  { %v1116_v14 = vpop.f32.mrf.mxu0 }
 0x19a   :  { %v1154_v15 = vpop.f32.mrf.mxu1  ;;  %v1117_v18 = vadd.f32 %v1116_v14, %v1115_v12 }
 0x19b   :  { %v1118_v16 = vpop.f32.mrf.mxu0  ;;  %v1155_v19 = vadd.f32 %v1154_v15, %v1153_v13 }
 0x19c   :  { %v1156_v17 = vpop.f32.mrf.mxu1 }
 0x19d   :  { %v1119_v20 = vpop.f32.mrf.mxu0  ;;  %v497_v25 = vadd.f32 %v1155_v19, %v1117_v18 }
 0x19e   :  { %v1120_v22 = vadd.f32 %v1119_v20, %v1118_v16  ;;  %v1157_v23 = vpop.f32.mrf.mxu1 }
 0x19f   :  { %v1158_v24 = vadd.f32 %v1157_v23, %v1156_v17 }
 0x1a1   :  { %v502_v26 = vadd.f32 %v1158_v24, %v1120_v22 }
 0x1a3   :  { %v505_v27 = vadd.f32 %v502_v26, %v497_v25 }
 0x1a5   :  { %1165 = vmatpush3.msra.mxu0 %v505_v27 }
 0x1a6   :  { %1167 = vmatmul.mubr.msk.f32.vlgmr.msra.gmra.mxu0 %vm513_vm10, %v506_v28  ;;  %1071 = vmatprep.subr.msk.mxu0 %vm721_vm13, %v715_v45 }
 0x1a7   :  { %794 = vmatprep.mubr.f32.mxu0 %v1212_v21  ;;  %1072 = vmatpush1.msk.msra.mxu0 %vm721_vm13, %v707_v43 }
 0x1a8   :  { %1077 = vmatprep.subr.msk.mxu0 %vm721_vm13, %v715_v45 }
 0x266   :  { %v583_v31 = vpop.f32.mrf.mxu0 }
 0x267   :  { %v584_v32 = vadd.f32 %v583_v31, %v511_v30 }
 0x268   :  { %v1168_v33 = vpop.f32.mrf.mxu0 }
 0x269   :  { %1169 = vmatprep.subr.msk.mxu1 %vm608_vm12, %v584_v32 }
 0x26a   :  { %1170 = vmatpush3.msk.msra.mxu1 %vm608_vm12, %v584_v32 }
 0x26b   :  { %1172 = vmatmul.mubr.msk.f32.vlgmr.msra.gmra.mxu1 %vm601_vm11, %v588_v34  ;;  %1074 = vmatprep.subr.msk.mxu1 %vm721_vm13, %v716_v46 }
 0x26c   :  { %865 = vmatprep.mubr.f32.mxu1 %v1212_v21  ;;  %1075 = vmatpush1.msk.msra.mxu1 %vm721_vm13, %v714_v44 }
 0x26d   :  { %1080 = vmatprep.subr.msk.mxu1 %vm721_vm13, %v716_v46 }
 0x32b   :  { %v1173_v47 = vpop.f32.mrf.mxu1 }
 0x32c   :  { %v684_v51 = vadd.f32 %v1173_v47, %v599_v49 }
 0x32d   :  { %v678_v50 = vpop.f32.mrf.mxu1 }
 0x32e   :  { %v679_v52 = vadd.f32 %v678_v50, %v594_v48 }
 0x330   :  { %v687_v53 = vmax.f32 %v679_v52, %v684_v51 }
 0x332   :  { %v688_v54 = vsub.f32 %v679_v52, %v687_v53  ;;  %v691_v55 = vsub.f32 %v684_v51, %v687_v53 }
 0x334   :  { %v689_v56 = vmul.f32 1.442695, %v688_v54  ;;  %v692_v57 = vmul.f32 1.442695, %v691_v55 }
 0x336   :  { %1184 = vpow2.f32 %v689_v56 }
 0x337   :  { %1186 = vpow2.f32 %v692_v57 }
 0x343   :  { %v1185_v58 = vpop.eup %1184 }
 0x344   :  { %v1187_v59 = vpop.eup %1186 }
 0x345   :  { %v694_v60 = vadd.f32 %v1187_v59, %v1185_v58 }
 0x347   :  { %1188 = vrcp.f32 %v694_v60 }
 0x354   :  { %v1189_v61 = vpop.eup %1188 }
 0x355   :  { %v698_v62 = vmul.f32 %v1189_v61, %v1185_v58  ;;  %v884_v63 = vmul.f32 %v1189_v61, %v1187_v59 }
 0x357   :  { %1073 = vmatmul.mubr.msk.f32.vlgmr.msra.gmra.mxu0 %vm717_vm14, %v698_v62  ;;  %1076 = vmatmul.mubr.msk.f32.vlgmr.msra.gmra.mxu1 %vm717_vm14, %v698_v62 }
 0x358   :  { %1078 = vmatpush1.msk.msra.mxu0 %vm721_vm13, %v707_v43  ;;  %952 = vmatprep.mubr.f32.mxu0 %v1212_v21 }
 0x359   :  { %1081 = vmatpush1.msk.msra.mxu1 %vm721_vm13, %v714_v44  ;;  %1023 = vmatprep.mubr.f32.mxu1 %v1212_v21 }
 0x35b   :  { %1079 = vmatmul.mubr.msk.f32.vlgmr.msra.gmra.mxu0 %vm717_vm14, %v884_v63  ;;  %1082 = vmatmul.mubr.msk.f32.vlgmr.msra.gmra.mxu1 %vm717_vm14, %v884_v63 }
 0x417   :  { %v796_v2 = vpop.f32.mrf.mxu0  ;;  %v867_v4 = vpop.f32.mrf.mxu1 }
 0x418   :  { %v876_v14 = vmul.f32 %v796_v2, %v1565_v1  ;;  %v878_v15 = vmul.f32 %v867_v4, %v1573_v5 }
 0x419   :  { %v798_v6 = vpop.f32.mrf.mxu0  ;;  %v869_v7 = vpop.f32.mrf.mxu1 }
 0x41a   :  { %v877_v21 = vmul.f32 %v798_v6, %v1562_v0  ;;  %v879_v18 = vmul.f32 %v869_v7, %v1568_v3 }
 0x41b   :  { %v954_v12 = vpop.f32.mrf.mxu0  ;;  %v1025_v13 = vpop.f32.mrf.mxu1 }
 0x41c   :  { %v1034_v16 = vmul.f32 %v954_v12, %v1582_v10  ;;  %v1036_v17 = vmul.f32 %v1025_v13, %v1585_v11 }
 0x41d   :  { %v956_v19 = vpop.f32.mrf.mxu0  ;;  %v1027_v20 = vpop.f32.mrf.mxu1 }
 0x41e   :  { %v1038_v22 = vadd.f32 %v1034_v16, %v876_v14  ;;  %v1040_v23 = vadd.f32 %v1036_v17, %v878_v15  ;;  %v1035_v24 = vmul.f32 %v956_v19, %v1576_v8  ;;  %v1037_v1 = vmul.f32 %v1027_v20, %v1579_v9 }
 0x420   :  { %1042 = vst [vmem:[#allocation3] sm:$0xff] %v1038_v22  ;;  %1045 = vst [vmem:[#allocation3 + $0x10] sm:$0xff] %v1040_v23  ;;  %v1039_v5 = vadd.f32 %v1035_v24, %v877_v21  ;;  %v1041_v10 = vadd.f32 %v1037_v1, %v879_v18 }
 0x422   :  { %1043 = vst [vmem:[#allocation3 + $0x8] sm:$0xff] %v1039_v5  ;;  %1046 = vst [vmem:[#allocation3 + $0x18] sm:$0xff] %v1041_v10 }
 0x423   :  { %1201 = shalt.err (!%p1198_p4)
}
 0x424   :  { %s1217_s14 = smov 256   ;;  %s1218_s15 = smov 16  }
 0x425   :  { %1058 = dma.vmem_to_hbm [thread:$0]  %s1053_s8, 512, %s1634_s10, [#allocation4], %s1217_s14, %s1217_s14, %s1218_s15  }
 0x426   :  { %1210 = dma.done.wait [#allocation4], 512  }
 0x427   :  { %1211 = vsyncadd [#allocation4], 4294966784 }
 0x428   :  { %1062 = vsyncpa [#allocation4], 1 }

</bundles_post_ra>
